<compile_context>
chip_gen: v6e
topology: v6e:2x2x1
jax: 0.10.0
libtpu: 0.0.40
codegen_flags: <defaults>
</compile_context>

<pallas_src>
import jax
import jax.numpy as jnp
from jax.experimental import pallas as pl
from jax.experimental.pallas import tpu as pltpu


def _round_up(n, m):
    return ((n + m - 1) // m) * m


def mlp_kernel(x_ref, w1_ref, b1_ref, w2_ref, b2_ref, w3_ref, b3_ref, o_ref):
    # x / W_i are bf16 (MXU operands), biases f32, all accumulation in f32.
    x = x_ref[...]                                                    # (TB, D_in)
    h = jnp.tanh(
        jnp.dot(x, w1_ref[...], preferred_element_type=jnp.float32) + b1_ref[...]
    )                                                                 # (TB, H1) f32
    h = jnp.tanh(
        jnp.dot(h.astype(w2_ref.dtype), w2_ref[...],
                preferred_element_type=jnp.float32) + b2_ref[...]
    )                                                                 # (TB, H2) f32
    logits = (
        jnp.dot(h.astype(w3_ref.dtype), w3_ref[...],
                preferred_element_type=jnp.float32) + b3_ref[...]
    )                                                                 # (TB, D_out_p)
    # F.hardtanh(logits, -1.0, 1.0)
    o_ref[...] = jnp.clip(logits, -1.0, 1.0).astype(o_ref.dtype)


def mlp_forward(x, params, *, tb=None, max_tb=512):
    """Fused MLP forward.

    x: [B, D_in] float32.
    params: (W1, b1, W2, b2, W3, b3) with W_i: [in, out], b_i: [1, out], float32.
    Returns: [B, D_out] float32.
    """
    w1, b1, w2, b2, w3, b3 = params
    B, d_in = x.shape
    h1, h2 = w1.shape[1], w2.shape[1]
    d_out = w3.shape[1]

    # --- lane-dense output: pad D_out up to a multiple of 128 with zero columns.
    d_out_p = _round_up(d_out, 128)
    if d_out_p != d_out:
        w3 = jnp.pad(w3, ((0, 0), (0, d_out_p - d_out)))
        b3 = jnp.pad(b3, ((0, 0), (0, d_out_p - d_out)))

    # --- batch tile: big enough to amortize per-step overhead, multiple of 8 rows;
    #     for large batches this keeps >=2 grid steps (feeds both v7x TensorCores).
    if tb is None:
        tb = max_tb
    tb = _round_up(min(tb, _round_up(B, 8)), 8)
    b_p = _round_up(B, tb)
    if b_p != B:
        x = jnp.pad(x, ((0, b_p - B), (0, 0)))

    # --- bf16 matmul operands, f32 biases/activations.
    x16 = x.astype(jnp.bfloat16)
    w1_16, w2_16, w3_16 = (w.astype(jnp.bfloat16) for w in (w1, w2, w3))
    b1_f, b2_f, b3_f = (b.astype(jnp.float32) for b in (b1, b2, b3))

    # Weights/biases use a constant block index -> resident in VMEM across steps.
    # Note: default double-buffering of these resident operands costs only a few
    # hundred KB of VMEM here, so we keep it (single-buffering is a minor saving).
    resident = lambda shape: pl.BlockSpec(shape, lambda i: (0, 0))

    flops = 2 * b_p * (d_in * h1 + h1 * h2 + h2 * d_out_p)
    transcendentals = b_p * (h1 + h2)
    bytes_accessed = (
        b_p * d_in * 2 + b_p * d_out_p * 4                      # streamed x / out
        + (d_in * h1 + h1 * h2 + h2 * d_out_p) * 2              # bf16 weights
        + (h1 + h2 + d_out_p) * 4                               # f32 biases
    )

    out_p = pl.pallas_call(
        mlp_kernel,
        out_shape=jax.ShapeDtypeStruct((b_p, d_out_p), jnp.float32),
        grid=(b_p // tb,),
        in_specs=[
            pl.BlockSpec((tb, d_in), lambda i: (i, 0)),          # x tile (streamed)
            resident(w1_16.shape), resident(b1_f.shape),
            resident(w2_16.shape), resident(b2_f.shape),
            resident(w3_16.shape), resident(b3_f.shape),
        ],
        out_specs=pl.BlockSpec((tb, d_out_p), lambda i: (i, 0)),
        compiler_params=pltpu.CompilerParams(
            dimension_semantics=("parallel",),
        ),
        cost_estimate=pl.CostEstimate(
            flops=flops,
            transcendentals=transcendentals,
            bytes_accessed=bytes_accessed,
        ),
    )(x16, w1_16, b1_f, w2_16, b2_f, w3_16, b3_f)

    return out_p[:B, :d_out]


def init_params(key, input_dim, output_dim, hidden=(256, 256)):
    """Deterministic synthetic init (uniform, like torch's default Linear init)."""
    dims = (input_dim,) + tuple(hidden) + (output_dim,)
    params = []
    for i in range(len(dims) - 1):
        fan_in, fan_out = dims[i], dims[i + 1]
        key, kw, kb = jax.random.split(key, 3)
        bound = 1.0 / jnp.sqrt(jnp.float32(fan_in))
        w = jax.random.uniform(kw, (fan_in, fan_out), jnp.float32, -bound, bound)
        b = jax.random.uniform(kb, (1, fan_out), jnp.float32, -bound, bound)
        params += [w, b]
    return tuple(params)


def mlp_reference_f32(x, params):
    w1, b1, w2, b2, w3, b3 = params
    h = jnp.tanh(x @ w1 + b1)
    h = jnp.tanh(h @ w2 + b2)
    return jnp.clip(h @ w3 + b3, -1.0, 1.0)


def mlp_reference_bf16(x, params):
    """Mirrors the kernel's bf16-operand / f32-accumulate numerics."""
    w1, b1, w2, b2, w3, b3 = params
    bf = jnp.bfloat16
    dot = lambda a, b: jnp.dot(a.astype(bf), b.astype(bf),
                               preferred_element_type=jnp.float32)
    h = jnp.tanh(dot(x, w1) + b1)
    h = jnp.tanh(dot(h, w2) + b2)
    return jnp.clip(dot(h, w3) + b3, -1.0, 1.0)


if __name__ == "__main__":
    key = jax.random.PRNGKey(0)
    B, D_IN, D_OUT = 16, 16, 8
    HIDDEN = (256, 256)   # module default hidden sizes

    key, kx = jax.random.split(key)
    x = jax.random.normal(kx, (B, D_IN), jnp.float32)
    params = init_params(key, D_IN, D_OUT, HIDDEN)

    out = mlp_forward(x, params)
    out = jax.block_until_ready(out)
    assert out.shape == (B, D_OUT)

    ref16 = mlp_reference_bf16(x, params)   # same bf16/f32 mixed numerics
    ref32 = mlp_reference_f32(x, params)    # pure-f32 torch-equivalent math
    assert jnp.allclose(out, ref16, atol=1e-3, rtol=1e-3), "mismatch vs bf16 reference"
    assert jnp.allclose(out, ref32, atol=5e-2, rtol=5e-2), "mismatch vs f32 reference"

    print("KERNEL_OK")
</pallas_src>

<mosaic_0001>
module attributes {stable_mosaic.version = 11 : i64} {
  func.func @mlp_kernel(%arg0: i32, %arg1: memref<16x16xbf16, #tpu.memory_space<vmem>>, %arg2: memref<16x256xbf16, #tpu.memory_space<vmem>>, %arg3: memref<1x256xf32, #tpu.memory_space<vmem>>, %arg4: memref<256x256xbf16, #tpu.memory_space<vmem>>, %arg5: memref<1x256xf32, #tpu.memory_space<vmem>>, %arg6: memref<256x128xbf16, #tpu.memory_space<vmem>>, %arg7: memref<1x128xf32, #tpu.memory_space<vmem>>, %arg8: memref<16x128xf32, #tpu.memory_space<vmem>>) attributes {dimension_semantics = [#tpu.dimension_semantics<parallel>], iteration_bounds = array<i64: 1>, scalar_prefetch = 0 : i64, scratch_operands = 0 : i64, tpu.core_type = #tpu.core_type<tc>, window_params = [{transform_indices = @transform_0, window_bounds = array<i64: 16, 16>}, {pipeline_mode = #tpu.pipeline_mode<synchronous>, transform_indices = @transform_1, window_bounds = array<i64: 16, 256>}, {pipeline_mode = #tpu.pipeline_mode<synchronous>, transform_indices = @transform_2, window_bounds = array<i64: 1, 256>}, {pipeline_mode = #tpu.pipeline_mode<synchronous>, transform_indices = @transform_3, window_bounds = array<i64: 256, 256>}, {pipeline_mode = #tpu.pipeline_mode<synchronous>, transform_indices = @transform_4, window_bounds = array<i64: 1, 256>}, {pipeline_mode = #tpu.pipeline_mode<synchronous>, transform_indices = @transform_5, window_bounds = array<i64: 256, 128>}, {pipeline_mode = #tpu.pipeline_mode<synchronous>, transform_indices = @transform_6, window_bounds = array<i64: 1, 128>}, {transform_indices = @transform_7, window_bounds = array<i64: 16, 128>}]} {
    %c0 = arith.constant 0 : index
    %c0_0 = arith.constant 0 : index
    %0 = vector.load %arg1[%c0, %c0_0] : memref<16x16xbf16, #tpu.memory_space<vmem>>, vector<16x16xbf16>
    %c0_1 = arith.constant 0 : index
    %c0_2 = arith.constant 0 : index
    %1 = vector.load %arg2[%c0_1, %c0_2] : memref<16x256xbf16, #tpu.memory_space<vmem>>, vector<16x256xbf16>
    %cst = arith.constant dense<0.000000e+00> : vector<16x256xf32>
    %2 = tpu.matmul %0, %1, %cst {dimension_numbers = #tpu.dot_dimension_numbers<[1], [0], [0], [1], [0, 0, 1, 1], [], []>} : vector<16x16xbf16>, vector<16x256xbf16>, vector<16x256xf32> -> vector<16x256xf32>
    %c0_3 = arith.constant 0 : index
    %c0_4 = arith.constant 0 : index
    %3 = vector.load %arg3[%c0_3, %c0_4] : memref<1x256xf32, #tpu.memory_space<vmem>>, vector<1x256xf32>
    %4 = vector.broadcast %3 : vector<1x256xf32> to vector<16x256xf32>
    %5 = arith.addf %2, %4 : vector<16x256xf32>
    %6 = math.tanh %5 : vector<16x256xf32>
    %7 = arith.truncf %6 : vector<16x256xf32> to vector<16x256xbf16>
    %c0_5 = arith.constant 0 : index
    %c0_6 = arith.constant 0 : index
    %8 = vector.load %arg4[%c0_5, %c0_6] : memref<256x256xbf16, #tpu.memory_space<vmem>>, vector<256x256xbf16>
    %cst_7 = arith.constant dense<0.000000e+00> : vector<16x256xf32>
    %9 = tpu.matmul %7, %8, %cst_7 {dimension_numbers = #tpu.dot_dimension_numbers<[1], [0], [0], [1], [0, 0, 1, 1], [], []>} : vector<16x256xbf16>, vector<256x256xbf16>, vector<16x256xf32> -> vector<16x256xf32>
    %c0_8 = arith.constant 0 : index
    %c0_9 = arith.constant 0 : index
    %10 = vector.load %arg5[%c0_8, %c0_9] : memref<1x256xf32, #tpu.memory_space<vmem>>, vector<1x256xf32>
    %11 = vector.broadcast %10 : vector<1x256xf32> to vector<16x256xf32>
    %12 = arith.addf %9, %11 : vector<16x256xf32>
    %13 = math.tanh %12 : vector<16x256xf32>
    %14 = arith.truncf %13 : vector<16x256xf32> to vector<16x256xbf16>
    %c0_10 = arith.constant 0 : index
    %c0_11 = arith.constant 0 : index
    %15 = vector.load %arg6[%c0_10, %c0_11] : memref<256x128xbf16, #tpu.memory_space<vmem>>, vector<256x128xbf16>
    %cst_12 = arith.constant dense<0.000000e+00> : vector<16x128xf32>
    %16 = tpu.matmul %14, %15, %cst_12 {dimension_numbers = #tpu.dot_dimension_numbers<[1], [0], [0], [1], [0, 0, 1, 1], [], []>} : vector<16x256xbf16>, vector<256x128xbf16>, vector<16x128xf32> -> vector<16x128xf32>
    %c0_13 = arith.constant 0 : index
    %c0_14 = arith.constant 0 : index
    %17 = vector.load %arg7[%c0_13, %c0_14] : memref<1x128xf32, #tpu.memory_space<vmem>>, vector<1x128xf32>
    %18 = vector.broadcast %17 : vector<1x128xf32> to vector<16x128xf32>
    %19 = arith.addf %16, %18 : vector<16x128xf32>
    %cst_15 = arith.constant -1.000000e+00 : f32
    %cst_16 = arith.constant 1.000000e+00 : f32
    %20 = vector.broadcast %cst_15 : f32 to vector<16x128xf32>
    %21 = arith.maximumf %20, %19 : vector<16x128xf32>
    %22 = vector.broadcast %cst_16 : f32 to vector<16x128xf32>
    %23 = arith.minimumf %22, %21 : vector<16x128xf32>
    %c0_17 = arith.constant 0 : index
    %c0_18 = arith.constant 0 : index
    %24 = vector.load %arg8[%c0_17, %c0_18] : memref<16x128xf32, #tpu.memory_space<vmem>>, vector<16x128xf32>
    tpu.vector_store %arg8[%c0_17, %c0_18], %23 {strides = array<i32>} : memref<16x128xf32, #tpu.memory_space<vmem>>, vector<16x128xf32>,
    return
  }
  func.func @transform_0(%arg0: i32) -> (i32, i32) {
    %c0_i32 = arith.constant 0 : i32
    %c0_i32_0 = arith.constant 0 : i32
    return %arg0, %c0_i32 : i32, i32
  }
  func.func @transform_1(%arg0: i32) -> (i32, i32) {
    %c0_i32 = arith.constant 0 : i32
    %c0_i32_0 = arith.constant 0 : i32
    %c0_i32_1 = arith.constant 0 : i32
    return %c0_i32, %c0_i32_0 : i32, i32
  }
  func.func @transform_2(%arg0: i32) -> (i32, i32) {
    %c0_i32 = arith.constant 0 : i32
    %c0_i32_0 = arith.constant 0 : i32
    %c0_i32_1 = arith.constant 0 : i32
    return %c0_i32, %c0_i32_0 : i32, i32
  }
  func.func @transform_3(%arg0: i32) -> (i32, i32) {
    %c0_i32 = arith.constant 0 : i32
    %c0_i32_0 = arith.constant 0 : i32
    %c0_i32_1 = arith.constant 0 : i32
    return %c0_i32, %c0_i32_0 : i32, i32
  }
  func.func @transform_4(%arg0: i32) -> (i32, i32) {
    %c0_i32 = arith.constant 0 : i32
    %c0_i32_0 = arith.constant 0 : i32
    %c0_i32_1 = arith.constant 0 : i32
    return %c0_i32, %c0_i32_0 : i32, i32
  }
  func.func @transform_5(%arg0: i32) -> (i32, i32) {
    %c0_i32 = arith.constant 0 : i32
    %c0_i32_0 = arith.constant 0 : i32
    %c0_i32_1 = arith.constant 0 : i32
    return %c0_i32, %c0_i32_0 : i32, i32
  }
  func.func @transform_6(%arg0: i32) -> (i32, i32) {
    %c0_i32 = arith.constant 0 : i32
    %c0_i32_0 = arith.constant 0 : i32
    %c0_i32_1 = arith.constant 0 : i32
    return %c0_i32, %c0_i32_0 : i32, i32
  }
  func.func @transform_7(%arg0: i32) -> (i32, i32) {
    %c0_i32 = arith.constant 0 : i32
    %c0_i32_0 = arith.constant 0 : i32
    return %arg0, %c0_i32 : i32, i32
  }
}

</mosaic_0001>

<bundles_post_ra>
// kernel: tpu_custom_call.1
= control target key start
LH: loop header
LB: loop body
LE: loop exit
PB: predicated region body
PF: predicated region fallthrough
CT: control target
= control target key end

     0   :  { %12 = vsyncpa [#allocation3], 0  ;;  %s983_s0 = inlined_call_operand.hbm [shape: bf16[16,16], index: 0, kind: input, shape index: {}]   ;;  %s984_s1 = inlined_call_operand.hbm [shape: bf16[16,256], index: 1, kind: input, shape index: {}]   ;;  %s985_s2 = inlined_call_operand.vmem [shape: f32[1,256], index: 2, kind: input, shape index: {}]   ;;  %s986_s3 = inlined_call_operand.hbm [shape: bf16[256,256], index: 3, kind: input, shape index: {}]   ;;  %s987_s4 = inlined_call_operand.vmem [shape: f32[1,256], index: 4, kind: input, shape index: {}]   ;;  %s988_s5 = inlined_call_operand.hbm [shape: bf16[256,128], index: 5, kind: input, shape index: {}]   ;;  %s989_s6 = inlined_call_operand.vmem [shape: f32[1,128], index: 6, kind: input, shape index: {}]   ;;  %s990_s7 = inlined_call_operand.hbm [shape: f32[16,128], index: 7, kind: output, shape index: {}]  }
   0x1   :  { %13 = vsyncpa [#allocation6], 0 }
   0x2   :  { %14 = vsyncpa [#allocation9], 0 }
   0x3   :  { %15 = vsyncpa [#allocation4], 0  ;;  %s900_s24 = smov [#allocation5]  }
   0x4   :  { %s33_s25 = sshll.u32 %s900_s24, 4  ;;  %s34_s25 = int_to_ptr.vmem [resolvable:$true] %s33_s25 }
   0x5   :  { %s800_s26 = scalar_lea.vmem %s34_s25, 256  ;;  %p805_p1 = scmp.lt.s32.totalorder %s34_s25, %s34_s25 }
   0x6   :  { %p801_p0 = scmp.ne.s32.totalorder %s34_s25, %s800_s26  ;;  %p806_p2 = scmp.lt.s32.totalorder %s800_s26, %s800_s26 }
   0x8   :  { %p807_p3 = por %p806_p2, %p805_p1 }
   0xa   :  { %p808_p4 = pnand %p807_p3, %p801_p0 }
   0xc   :  { %811 = shalt.err (!%p808_p4)
}
   0xd   :  { %s901_s27 = smov 128   ;;  %s902_s28 = smov 8  }
   0xe   :  { %39 = dma.hbm_to_vmem [thread:$0]  %s984_s1, 256, %s34_s25, [#allocation6], %s901_s27, %s901_s27, %s902_s28  }
   0xf   :  { %s903_s8 = smov [#allocation2]  }
  0x10   :  { %s21_s9 = sshll.u32 %s903_s8, 4  ;;  %s22_s9 = int_to_ptr.vmem [resolvable:$true] %s21_s9 }
  0x11   :  { %s820_s10 = scalar_lea.vmem %s22_s9, 128  ;;  %p825_p6 = scmp.lt.s32.totalorder %s22_s9, %s22_s9 }
  0x12   :  { %p821_p5 = scmp.ne.s32.totalorder %s22_s9, %s820_s10  ;;  %p826_p7 = scmp.lt.s32.totalorder %s820_s10, %s820_s10 }
  0x14   :  { %p827_p8 = por %p826_p7, %p825_p6 }
  0x16   :  { %p828_p9 = pnand %p827_p8, %p821_p5 }
  0x18   :  { %831 = shalt.err (!%p828_p9)
}
  0x19   :  { %s904_s11 = smov 64   ;;  %s905_s12 = smov 4  }
  0x1a   :  { %27 = dma.hbm_to_vmem [thread:$0]  %s983_s0, 128, %s22_s9, [#allocation3], %s904_s11, %s904_s11, %s905_s12  }
  0x1b   :  { %s906_s15 = smov [#allocation7]   ;;  %s907_s17 = smov [#allocation8]  }
  0x1c   :  { %s47_s16 = sshll.u32 %s906_s15, 4  ;;  %s61_s1 = sshll.u32 %s907_s17, 4  ;;  %s48_s16 = int_to_ptr.vmem [resolvable:$true] %s47_s16  ;;  %s62_s1 = int_to_ptr.vmem [resolvable:$true] %s61_s1 }
  0x1d   :  { %s840_s18 = scalar_lea.vmem %s48_s16, 4096  ;;  %p845_p11 = scmp.lt.s32.totalorder %s48_s16, %s48_s16 }
  0x1e   :  { %p841_p10 = scmp.ne.s32.totalorder %s48_s16, %s840_s18  ;;  %p846_p12 = scmp.lt.s32.totalorder %s840_s18, %s840_s18 }
  0x20   :  { %p847_p13 = por %p846_p12, %p845_p11 }
  0x22   :  { %p848_p0 = pnand %p847_p13, %p841_p10 }
  0x24   :  { %851 = shalt.err (!%p848_p0)
}
  0x25   :  { %53 = dma.hbm_to_vmem [thread:$0]  %s986_s3, 4096, %s48_s16, [#allocation6], %s901_s27, %s901_s27, %s902_s28  }
  0x26   :  { %s860_s0 = scalar_lea.vmem %s62_s1, 2048  ;;  %p865_p2 = scmp.lt.s32.totalorder %s62_s1, %s62_s1 }
  0x27   :  { %p861_p1 = scmp.ne.s32.totalorder %s62_s1, %s860_s0  ;;  %p866_p3 = scmp.lt.s32.totalorder %s860_s0, %s860_s0 }
  0x29   :  { %p867_p4 = por %p866_p3, %p865_p2 }
  0x2b   :  { %p868_p5 = pnand %p867_p4, %p861_p1 }
  0x2d   :  { %871 = shalt.err (!%p868_p5)
}
  0x2e   :  { %67 = dma.hbm_to_vmem [thread:$0]  %s988_s5, 2048, %s62_s1, [#allocation9], %s904_s11, %s904_s11, %s905_s12  }
  0x2f   :  { %892 = dma.done.wait [#allocation3], 128  }
  0x30   :  { %893 = vsyncadd [#allocation3], 4294967168 }
  0x31   :  { %894 = dma.done.wait [#allocation6], 4352  }
  0x32   :  { %895 = vsyncadd [#allocation6], 4294962944 }
  0x33   :  { %896 = dma.done.wait [#allocation9], 2048  }
  0x34   :  { %897 = vsyncadd [#allocation9], 4294965248  ;;  %v908_v0 = vmov 0   ;;  %v708_v1 = vld [vmem:[#allocation5 + $0x4] ss:$8 sps:$4 sm:$0xff]   ;;  %v711_v3 = vld [vmem:[#allocation2] sm:$0xff]   ;;  %v89_v40 = vlaneseq }
  0x35   :  { %150 = vmatprep.mubr.bf16.mxu0 %v908_v0  ;;  %v710_v2 = vld [vmem:[#allocation5] ss:$8 sps:$4 sm:$0xff]   ;;  %132 = vmatprep.subr.bf16.mxu0 %v708_v1  ;;  %vm114_vm0 = vcmask 130048   ;;  %v712_v4 = vld [vmem:[#allocation7 + $0x74] ss:$8 sps:$4 sm:$0xff]   ;;  %v764_v61 = vld [vmem:[#allocation8 + $0x68] sm:$0xff]  }
  0x36   :  { %133 = vmatpush1.bf16.msra.mxu0 %v710_v2  ;;  %v714_v5 = vld [vmem:[#allocation7 + $0x70] ss:$8 sps:$4 sm:$0xff]   ;;  %v715_v6 = vld [vmem:[#allocation7 + $0x64] ss:$8 sps:$4 sm:$0xff]   ;;  %371 = vmatprep.subr.bf16.mxu1 %v712_v4  ;;  %v717_v7 = vld [vmem:[#allocation7 + $0x60] ss:$8 sps:$4 sm:$0xff]  }
  0x37   :  { %372 = vmatpush1.bf16.msra.mxu1 %v714_v5  ;;  %v718_v8 = vld [vmem:[#allocation7 + $0x54] ss:$8 sps:$4 sm:$0xff]   ;;  %v720_v9 = vld [vmem:[#allocation7 + $0x50] ss:$8 sps:$4 sm:$0xff]   ;;  %v721_v10 = vld [vmem:[#allocation7 + $0x44] ss:$8 sps:$4 sm:$0xff]  }
  0x38   :  { %373 = vmatprep.subr.bf16.mxu1 %v715_v6  ;;  %v723_v11 = vld [vmem:[#allocation7 + $0x40] ss:$8 sps:$4 sm:$0xff]   ;;  %v724_v12 = vld [vmem:[#allocation7 + $0x34] ss:$8 sps:$4 sm:$0xff]   ;;  %v726_v13 = vld [vmem:[#allocation7 + $0x30] ss:$8 sps:$4 sm:$0xff]  }
  0x39   :  { %624 = vmatmul.mubr.msk.bf16.vlgmr.msra.gmra.mxu0 %vm114_vm0, %v711_v3  ;;  %v727_v14 = vld [vmem:[#allocation7 + $0x24] ss:$8 sps:$4 sm:$0xff]   ;;  %v729_v15 = vld [vmem:[#allocation7 + $0x20] ss:$8 sps:$4 sm:$0xff]   ;;  %v730_v16 = vld [vmem:[#allocation7 + $0x14] ss:$8 sps:$4 sm:$0xff]  }
  0x3a   :  { %v732_v17 = vld [vmem:[#allocation7 + $0x10] ss:$8 sps:$4 sm:$0xff]   ;;  %v733_v18 = vld [vmem:[#allocation7 + $0x4] ss:$8 sps:$4 sm:$0xff]   ;;  %v735_v19 = vld [vmem:[#allocation7] ss:$8 sps:$4 sm:$0xff]  }
  0x3b   :  { %374 = vmatpush1.bf16.msra.mxu1 %v717_v7  ;;  %v736_v20 = vld [vmem:[#allocation7 + $0xf4] ss:$8 sps:$4 sm:$0xff]   ;;  %v738_v21 = vld [vmem:[#allocation7 + $0xf0] ss:$8 sps:$4 sm:$0xff]   ;;  %v739_v22 = vld [vmem:[#allocation7 + $0xe4] ss:$8 sps:$4 sm:$0xff]  }
  0x3c   :  { %375 = vmatprep.subr.bf16.mxu1 %v718_v8  ;;  %v741_v23 = vld [vmem:[#allocation7 + $0xe0] ss:$8 sps:$4 sm:$0xff]   ;;  %v742_v24 = vld [vmem:[#allocation7 + $0xd4] ss:$8 sps:$4 sm:$0xff]   ;;  %v744_v25 = vld [vmem:[#allocation7 + $0xd0] ss:$8 sps:$4 sm:$0xff]  }
  0x3d   :  { %v745_v26 = vld [vmem:[#allocation7 + $0xc4] ss:$8 sps:$4 sm:$0xff]   ;;  %v747_v27 = vld [vmem:[#allocation7 + $0xc0] ss:$8 sps:$4 sm:$0xff]   ;;  %v748_v28 = vld [vmem:[#allocation7 + $0xb4] ss:$8 sps:$4 sm:$0xff]  }
  0x3e   :  { %v750_v29 = vld [vmem:[#allocation7 + $0xb0] ss:$8 sps:$4 sm:$0xff]   ;;  %v751_v30 = vld [vmem:[#allocation7 + $0xa4] ss:$8 sps:$4 sm:$0xff]   ;;  %v753_v31 = vld [vmem:[#allocation7 + $0xa0] ss:$8 sps:$4 sm:$0xff]  }
  0x3f   :  { %376 = vmatpush1.bf16.msra.mxu1 %v720_v9  ;;  %v754_v32 = vld [vmem:[#allocation7 + $0x94] ss:$8 sps:$4 sm:$0xff]   ;;  %v756_v33 = vld [vmem:[#allocation7 + $0x90] ss:$8 sps:$4 sm:$0xff]   ;;  %v757_v34 = vld [vmem:[#allocation7 + $0x84] ss:$8 sps:$4 sm:$0xff]  }
  0x40   :  { %377 = vmatprep.subr.bf16.mxu1 %v721_v10  ;;  %v759_v35 = vld [vmem:[#allocation7 + $0x80] ss:$8 sps:$4 sm:$0xff]   ;;  %v760_v36 = vld [vmem:[#allocation8 + $0x78] sm:$0xff]   ;;  %v762_v38 = vld [vmem:[#allocation8 + $0x70] sm:$0xff]   ;;  %v90_v41 = vshrl.u32 %v89_v40, 7  ;;  %s909_s25 = smov [#allocation10]  }
  0x41   :  { %v761_v37 = vld [vmem:[#allocation8 + $0x38] sm:$0xff]   ;;  %676 = vmatprep.subr.bf16.mxu0 %v760_v36  ;;  %v763_v39 = vld [vmem:[#allocation8 + $0x30] sm:$0xff]   ;;  %v87_v43 = vld [vmem:[%s985_s2] sm:$0x3]  ;;  %s607_s26 = sshll.u32 %s909_s25, 4  ;;  %s608_s26 = int_to_ptr.vmem [resolvable:$true] %s607_s26 }
  0x42   :  { %677 = vmatpush3.bf16.msra.mxu0 %v761_v37  ;;  %v95_v42 = vsub.s32 1, %v90_v41  ;;  %v91_v44 = vsub.s32 0, %v90_v41  ;;  %v765_v62 = vld [vmem:[#allocation8 + $0x28] sm:$0xff]   ;;  %v766_v63 = vld [vmem:[#allocation8 + $0x60] sm:$0xff]   ;;  %v768_v1 = vld [vmem:[#allocation8 + $0x58] sm:$0xff]   ;;  %s872_s29 = scalar_lea.vmem %s608_s26, 256  ;;  %p877_p7 = scmp.lt.s32.totalorder %s608_s26, %s608_s26 }
  0x43   :  { %378 = vmatpush1.bf16.msra.mxu1 %v723_v11  ;;  %678 = vmatprep.subr.bf16.mxu0 %v762_v38  ;;  %v767_v0 = vld [vmem:[#allocation8 + $0x20] sm:$0xff]   ;;  %v769_v2 = vld [vmem:[#allocation8 + $0x18] sm:$0xff]   ;;  %v770_v3 = vld [vmem:[#allocation8 + $0x50] sm:$0xff]   ;;  %p873_p6 = scmp.ne.s32.totalorder %s608_s26, %s872_s29  ;;  %p878_p8 = scmp.lt.s32.totalorder %s872_s29, %s872_s29 }
  0x44   :  { %379 = vmatprep.subr.bf16.mxu1 %v724_v12  ;;  %v96_v45 = vrot.slane %v87_v43, %v95_v42  ;;  %v92_v47 = vrot.slane %v87_v43, %v91_v44  ;;  %v771_v4 = vld [vmem:[#allocation8 + $0x10] sm:$0xff]   ;;  %v772_v5 = vld [vmem:[#allocation8 + $0x48] sm:$0xff]   ;;  %v774_v7 = vld [vmem:[#allocation8 + $0x40] sm:$0xff]  }
  0x45   :  { %v773_v6 = vld [vmem:[#allocation8 + $0x8] sm:$0xff]   ;;  %v775_v8 = vld [vmem:[#allocation8] sm:$0xff]   ;;  %p879_p9 = por %p878_p8, %p877_p7 }
  0x46   :  { %679 = vmatpush3.bf16.msra.mxu0 %v763_v39  ;;  %v199_v9 = vld [vmem:[%s987_s4] sm:$0x3] }
  0x47   :  { %380 = vmatpush1.bf16.msra.mxu1 %v726_v13  ;;  %680 = vmatprep.subr.bf16.mxu0 %v764_v61  ;;  %v208_v10 = vrot.slane %v199_v9, %v95_v42  ;;  %v204_v12 = vrot.slane %v199_v9, %v91_v44  ;;  %p880_p10 = pnand %p879_p9, %p873_p6 }
  0x48   :  { %381 = vmatprep.subr.bf16.mxu1 %v727_v14 }
  0x4a   :  { %681 = vmatpush3.bf16.msra.mxu0 %v765_v62 }
  0x4b   :  { %382 = vmatpush1.bf16.msra.mxu1 %v729_v15  ;;  %682 = vmatprep.subr.bf16.mxu0 %v766_v63 }
  0x4c   :  { %383 = vmatprep.subr.bf16.mxu1 %v730_v16 }
  0x4e   :  { %683 = vmatpush3.bf16.msra.mxu0 %v767_v0 }
  0x4f   :  { %384 = vmatpush1.bf16.msra.mxu1 %v732_v17  ;;  %684 = vmatprep.subr.bf16.mxu0 %v768_v1 }
  0x50   :  { %385 = vmatprep.subr.bf16.mxu1 %v733_v18 }
  0x52   :  { %685 = vmatpush3.bf16.msra.mxu0 %v769_v2 }
  0x53   :  { %386 = vmatpush1.bf16.msra.mxu1 %v735_v19  ;;  %686 = vmatprep.subr.bf16.mxu0 %v770_v3 }
  0x54   :  { %387 = vmatprep.subr.bf16.mxu1 %v736_v20 }
  0x56   :  { %687 = vmatpush3.bf16.msra.mxu0 %v771_v4 }
  0x57   :  { %388 = vmatpush2.bf16.msra.mxu1 %v738_v21  ;;  %688 = vmatprep.subr.bf16.mxu0 %v772_v5 }
  0x58   :  { %389 = vmatprep.subr.bf16.mxu1 %v739_v22 }
  0x5a   :  { %689 = vmatpush3.bf16.msra.mxu0 %v773_v6 }
  0x5b   :  { %390 = vmatpush2.bf16.msra.mxu1 %v741_v23  ;;  %690 = vmatprep.subr.bf16.mxu0 %v774_v7 }
  0x5c   :  { %391 = vmatprep.subr.bf16.mxu1 %v742_v24 }
  0x5e   :  { %691 = vmatpush3.bf16.msra.mxu0 %v775_v8 }
  0x5f   :  { %392 = vmatpush2.bf16.msra.mxu1 %v744_v25 }
  0x60   :  { %393 = vmatprep.subr.bf16.mxu1 %v745_v26 }
  0x63   :  { %394 = vmatpush2.bf16.msra.mxu1 %v747_v27  ;;  %v657_v27 = vld [vmem:[%s989_s6] ss:$0 sm:$0xff] }
  0x64   :  { %395 = vmatprep.subr.bf16.mxu1 %v748_v28 }
  0x67   :  { %396 = vmatpush2.bf16.msra.mxu1 %v750_v29 }
  0x68   :  { %397 = vmatprep.subr.bf16.mxu1 %v751_v30 }
  0x6b   :  { %398 = vmatpush2.bf16.msra.mxu1 %v753_v31 }
  0x6c   :  { %399 = vmatprep.subr.bf16.mxu1 %v754_v32 }
  0x6f   :  { %400 = vmatpush2.bf16.msra.mxu1 %v756_v33 }
  0x70   :  { %401 = vmatprep.subr.bf16.mxu1 %v757_v34 }
  0x73   :  { %402 = vmatpush2.bf16.msra.mxu1 %v759_v35 }
  0xf9   :  { %v152_v46 = vpop.f32.mrf.mxu0 }
  0xfa   :  { %v153_v52 = vadd.f32 %v152_v46, %v92_v47 }
  0xfb   :  { %v154_v48 = vpop.f32.mrf.mxu0 }
  0xfc   :  { %v155_v49 = vadd.f32 %v154_v48, %v96_v45 }
  0xfd   :  { %v156_v50 = vpop.f32.mrf.mxu0 }
  0xfe   :  { %v157_v51 = vadd.f32 %v156_v50, %v92_v47  ;;  %776 = vtanh.f32 %v155_v49 }
  0xff   :  { %v158_v53 = vpop.f32.mrf.mxu0 }
 0x100   :  { %v159_v54 = vadd.f32 %v158_v53, %v96_v45  ;;  %778 = vtanh.f32 %v157_v51 }
 0x102   :  { %780 = vtanh.f32 %v159_v54 }
 0x103   :  { %782 = vtanh.f32 %v153_v52 }
 0x10b   :  { %v777_v55 = vpop.eup %776 }
 0x10d   :  { %v779_v56 = vpop.eup %778 }
 0x10f   :  { %v781_v57 = vpop.eup %780 }
 0x110   :  { %v783_v58 = vpop.eup %782  ;;  %v166_v59 = vpack.c.bf16 %v781_v57, %v777_v55 }
 0x111   :  { %v165_v60 = vpack.c.bf16 %v779_v56, %v783_v58 }
 0x112   :  { %403 = vmatprep.mubr.bf16.mxu1 %v166_v59 }
 0x113   :  { %404 = vmatmul.mubr.bf16.vlgmr.msra.gmra.mxu1 %v165_v60 }
 0x1d3   :  { %v405_v11 = vpop.f32.mrf.mxu1 }
 0x1d4   :  { %v406_v17 = vadd.f32 %v405_v11, %v204_v12 }
 0x1d5   :  { %v407_v13 = vpop.f32.mrf.mxu1 }
 0x1d6   :  { %v408_v14 = vadd.f32 %v407_v13, %v208_v10 }
 0x1d7   :  { %v409_v15 = vpop.f32.mrf.mxu1 }
 0x1d8   :  { %v410_v16 = vadd.f32 %v409_v15, %v204_v12  ;;  %784 = vtanh.f32 %v408_v14 }
 0x1d9   :  { %v411_v18 = vpop.f32.mrf.mxu1 }
 0x1da   :  { %v412_v19 = vadd.f32 %v411_v18, %v208_v10  ;;  %786 = vtanh.f32 %v410_v16 }
 0x1dc   :  { %788 = vtanh.f32 %v412_v19 }
 0x1dd   :  { %790 = vtanh.f32 %v406_v17 }
 0x1e5   :  { %v785_v20 = vpop.eup %784 }
 0x1e7   :  { %v787_v21 = vpop.eup %786 }
 0x1e9   :  { %v789_v22 = vpop.eup %788 }
 0x1ea   :  { %v791_v23 = vpop.eup %790  ;;  %v419_v24 = vpack.c.bf16 %v789_v22, %v785_v20 }
 0x1eb   :  { %v418_v25 = vpack.c.bf16 %v787_v21, %v791_v23 }
 0x1ec   :  { %587 = vmatprep.mubr.bf16.mxu0 %v419_v24 }
 0x1ed   :  { %588 = vmatmul.mubr.bf16.vlgmr.msra.gmra.mxu0 %v418_v25 }
 0x2ad   :  { %v692_v26 = vpop.f32.mrf.mxu0 }
 0x2af   :  { %v693_v28 = vpop.f32.mrf.mxu0 }
 0x2b0   :  { %v694_v29 = vadd.f32 %v693_v28, %v692_v26 }
 0x2b1   :  { %v695_v30 = vpop.f32.mrf.mxu0 }
 0x2b2   :  { %v590_v31 = vadd.f32 %v694_v29, %v657_v27 }
 0x2b3   :  { %v696_v32 = vpop.f32.mrf.mxu0 }
 0x2b4   :  { %v674_v33 = vclamps-f32 %v590_v31, 1.0  ;;  %v697_v34 = vadd.f32 %v696_v32, %v695_v30 }
 0x2b6   :  { %600 = vst [vmem:[#allocation10] sm:$0xff] %v674_v33  ;;  %v593_v35 = vadd.f32 %v697_v34, %v657_v27 }
 0x2b8   :  { %v675_v36 = vclamps-f32 %v593_v35, 1.0 }
 0x2ba   :  { %601 = vst [vmem:[#allocation10 + $0x8] sm:$0xff] %v675_v36 }
 0x2bb   :  { %883 = shalt.err (!%p880_p10)
}
 0x2bc   :  { %613 = dma.vmem_to_hbm [thread:$0]  %s608_s26, 256, %s990_s7, [#allocation4], %s901_s27, %s901_s27, %s902_s28  }
 0x2bd   :  { %898 = dma.done.wait [#allocation4], 256  }
 0x2be   :  { %899 = vsyncadd [#allocation4], 4294967040 }
 0x2bf   :  { %617 = vsyncpa [#allocation3], 1 }
 0x2c0   :  { %618 = vsyncpa [#allocation6], 1 }
 0x2c1   :  { %619 = vsyncpa [#allocation9], 1 }
 0x2c2   :  { %620 = vsyncpa [#allocation4], 1 }

</bundles_post_ra>
